<compile_context>
chip_gen: v7x
topology: tpu7x:2x2x1
jax: 0.10.0
libtpu: 0.0.40
codegen_flags: <defaults>
</compile_context>

<pallas_src>
from functools import partial

import numpy as np
import jax
import jax.numpy as jnp
from jax import lax
from jax.experimental import pallas as pl
from jax.experimental.pallas import tpu as pltpu

KERNEL_SIZE = 10     # nn.Conv1d(..., kernel_size=10, dilation=1)
_LANE = 128
_SUBLANE = 8


def _round_up(x, m):
    return ((x + m - 1) // m) * m


# ----------------------------------------------------------------------------
# Fused kernel
# ----------------------------------------------------------------------------
def _build_fused_kernel(bb, L, Lseg, conv_cfg, pad_tail, p_last, n_dense):
    """conv_cfg: tuple of (p_in, p_out, K, d) per conv layer (8-padded channels)."""
    n_conv = len(conv_cfg)

    def kernel(*refs):
        x_ref = refs[0]
        conv_w = [refs[1 + 2 * i] for i in range(n_conv)]
        conv_b = [refs[2 + 2 * i] for i in range(n_conv)]
        off = 1 + 2 * n_conv
        dense_w = [refs[off + 2 * i] for i in range(n_dense)]
        dense_b = [refs[off + 2 * i + 1] for i in range(n_dense)]
        o_ref = refs[off + 2 * n_dense]

        # ---- Batch-folded, zero-padded global buffer (one lane-dense row). ----
        xv = x_ref[...]                                        # (bb, L)
        pieces = []
        for b in range(bb):
            pieces.append(xv[b:b + 1, :])                      # 128-aligned placement
            if Lseg > L:
                pieces.append(jnp.zeros((1, Lseg - L), jnp.float32))
        if pad_tail > 0:
            pieces.append(jnp.zeros((1, pad_tail), jnp.float32))
        row = pieces[0] if len(pieces) == 1 else jnp.concatenate(pieces, axis=1)
        # Sublane-broadcast to 8 rows; rows >= 1 only ever meet zero weight cols.
        first_rows = conv_cfg[0][0] if n_conv > 0 else p_last
        h = jnp.broadcast_to(row, (first_rows, row.shape[1]))

        # ---- Conv stack: ONE in-register im2col + ONE dot per layer (batch folded).
        for i, (p_in, p_out, K, d) in enumerate(conv_cfg):
            G = h.shape[1]
            lout = G - (K - 1) * d
            # all operands are 8-row aligned (p_in % 8 == 0): unmasked placement
            cols = jnp.concatenate([h[:, k * d:k * d + lout] for k in range(K)],
                                   axis=0)                      # (K*p_in, lout)
            y = jnp.dot(conv_w[i][...], cols,
                        preferred_element_type=jnp.float32)
            y = jnp.maximum(y + conv_b[i][...], 0.0)            # bias + ReLU
            lp = lout - d
            h = jnp.maximum(y[:, 0:lp], y[:, d:d + lp])         # MaxPool1d(2) on valid samples

        assert h.shape[0] == p_last and h.shape[1] == bb * Lseg

        # ---- Stack per-sample flattened activations: A (bb, p_last*Lseg). ----
        w_flat = p_last * Lseg
        rows = []
        for b in range(bb):
            segs = [h[c:c + 1, b * Lseg:(b + 1) * Lseg] for c in range(p_last)]
            rows.append(segs[0] if len(segs) == 1 else jnp.concatenate(segs, axis=1))
        if bb == 1:
            A = rows[0]
        else:
            ridx = lax.broadcasted_iota(jnp.int32, (bb, w_flat), 0)
            A = jnp.zeros((bb, w_flat), jnp.float32)
            for b in range(bb):
                A = jnp.where(ridx == b, jnp.broadcast_to(rows[b], (bb, w_flat)), A)

        # ---- Dense stack: one NT dot per layer for the whole batch. -----------
        nt = (((1,), (1,)), ((), ()))                           # contract last-with-last
        cur = lax.dot_general(A, dense_w[0][...], nt,
                              preferred_element_type=jnp.float32) + dense_b[0][...]
        for j in range(1, n_dense):
            cur = lax.dot_general(jnp.maximum(cur, 0.0), dense_w[j][...], nt,
                                  preferred_element_type=jnp.float32) + dense_b[j][...]

        # ---- log_softmax on the pre-ReLU output of the last dense layer. ------
        m = jnp.max(cur, axis=-1, keepdims=True)
        z = cur - m
        lse = jnp.log(jnp.sum(jnp.exp(z), axis=-1, keepdims=True))
        o_ref[...] = z - lse                                    # single store

    return kernel


# ----------------------------------------------------------------------------
# Parameter preparation (done ONCE, outside the jitted forward)
# ----------------------------------------------------------------------------
def prepare_params(conv_params, dense_params, input_len):
    """Repack PyTorch-layout parameters into the fused-kernel layout."""
    Lseg = _round_up(input_len, _LANE)

    conv_ws, conv_bs = [], []
    lbuf, d, n_valid, cin = input_len, 1, input_len, 1
    for (w_pt, b_pt) in conv_params:                   # w_pt: (Cout, Cin, K)
        w_np = np.asarray(w_pt, np.float32)
        b_np = np.asarray(b_pt, np.float32)
        cout, cin_w, k = w_np.shape
        assert cin_w == cin, (cin_w, cin)
        p_in, p_out = _round_up(cin, _SUBLANE), _round_up(cout, _SUBLANE)
        # Sublane-aligned (p_out, K*p_in) weight; column index = tap*p_in + chan,
        # zero at padded channels.
        wpad = np.zeros((p_out, k * p_in), np.float32)
        for kk in range(k):
            wpad[:cout, kk * p_in:kk * p_in + cin] = w_np[:, :, kk]
        bpad = np.zeros((p_out, 1), np.float32)
        bpad[:cout, 0] = b_np
        conv_ws.append(jnp.asarray(wpad))
        conv_bs.append(jnp.asarray(bpad))
        # Dilated-buffer bookkeeping (per sample); fail loudly on degenerate configs.
        lout = lbuf - (k - 1) * d
        assert lout > d, "conv/pool stack degenerates (lout <= dilation)"
        n_valid = (n_valid - k + 1) // 2
        assert n_valid >= 1, "conv/pool stack produces no valid outputs"
        lbuf = lout - d
        d *= 2
        cin = cout
    c_last = cin
    p_last = _round_up(c_last, _SUBLANE)
    assert (n_valid - 1) * d < lbuf <= Lseg

    dense_ws, dense_bs = [], []
    for idx, (w_pt, b_pt) in enumerate(dense_params):   # w_pt: (Dout, Din)
        w_np = np.asarray(w_pt, np.float32)
        b_np = np.asarray(b_pt, np.float32)
        dout, din = w_np.shape
        if idx == 0:
            assert din == c_last * n_valid, (din, c_last, n_valid)
            # Fold the PyTorch (B, C, L) flatten + the dilated valid-position
            # selection into a lane-dense (Dout, p_last*Lseg) weight.  Invalid /
            # padded positions get zero weight (their activations are garbage
            # but finite, so they contribute exactly 0).
            w_exp = np.zeros((dout, p_last * Lseg), np.float32)
            w_r = w_np.reshape(dout, c_last, n_valid)
            cols = np.arange(n_valid) * d
            for c in range(c_last):
                w_exp[:, c * Lseg + cols] = w_r[:, c, :]
            dense_ws.append(jnp.asarray(w_exp))
        else:
            dense_ws.append(jnp.asarray(w_np))          # keep (Dout, Din): NT dot in-kernel
        dense_bs.append(jnp.asarray(b_np.reshape(1, dout)))
    return tuple(conv_ws), tuple(conv_bs), tuple(dense_ws), tuple(dense_bs)


# ----------------------------------------------------------------------------
# Forward (single pallas_call; optional parallel batch grid for v7x)
# ----------------------------------------------------------------------------
@partial(jax.jit, static_argnames=("num_blocks",))
def simple_cnn_forward(x, conv_ws, conv_bs, dense_ws, dense_bs, num_blocks=1):
    """Equivalent of simple_CNN.forward with smax_l=True (one fused kernel)."""
    batch = x.shape[0]
    x = x.reshape(batch, -1).astype(jnp.float32)        # x.view(B, 1, -1): Cin = 1
    L = x.shape[1]
    if batch % num_blocks != 0:
        num_blocks = 1
    bb = batch // num_blocks
    Lseg = _round_up(L, _LANE)

    # Derive the static conv configuration from the packed weight shapes.
    conv_cfg = []
    p_in, d, pad_tail = _SUBLANE, 1, 0
    for w in conv_ws:
        p_out, kpin = w.shape
        assert kpin % p_in == 0
        K = kpin // p_in
        conv_cfg.append((p_in, p_out, K, d))
        pad_tail += K * d
        d *= 2
        p_in = p_out
    p_last = conv_ws[-1].shape[0] if conv_ws else _SUBLANE
    assert dense_ws[0].shape[1] == p_last * Lseg, "params / input length mismatch"

    n_dense = len(dense_ws)
    n_classes = dense_ws[-1].shape[0]

    x3 = x.reshape(num_blocks, bb, L)
    kernel = _build_fused_kernel(bb, L, Lseg, tuple(conv_cfg), pad_tail, p_last, n_dense)

    in_specs = [pl.BlockSpec((None, bb, L), lambda i: (i, 0, 0))]
    args = [x3]
    for w, b in zip(conv_ws, conv_bs):
        in_specs += [pl.BlockSpec(w.shape, lambda i: (0, 0)),
                     pl.BlockSpec(b.shape, lambda i: (0, 0))]
        args += [w, b]
    for w, b in zip(dense_ws, dense_bs):
        in_specs += [pl.BlockSpec(w.shape, lambda i: (0, 0)),
                     pl.BlockSpec(b.shape, lambda i: (0, 0))]
        args += [w, b]

    out = pl.pallas_call(
        kernel,
        out_shape=jax.ShapeDtypeStruct((num_blocks, bb, n_classes), jnp.float32),
        grid=(num_blocks,),
        in_specs=in_specs,
        out_specs=pl.BlockSpec((None, bb, n_classes), lambda i: (i, 0, 0)),
        compiler_params=pltpu.CompilerParams(dimension_semantics=("parallel",)),
    )(*args)
    return out.reshape(batch, n_classes)


# ----------------------------------------------------------------------------
# Pure-JAX reference (for correctness check)
# ----------------------------------------------------------------------------
def reference_forward(x, conv_params, dense_params):
    B = x.shape[0]
    h = x.reshape(B, 1, -1)
    for (w, b) in conv_params:
        h = jax.lax.conv_general_dilated(
            h, w, window_strides=(1,), padding="VALID",
            dimension_numbers=("NCH", "OIH", "NCH"),
            precision=jax.lax.Precision.HIGHEST)
        h = jnp.maximum(h + b[None, :, None], 0.0)
        C, Lc = h.shape[1], h.shape[2]
        P = Lc // 2
        h = jnp.max(h[:, :, :2 * P].reshape(B, C, P, 2), axis=-1)
    h = h.reshape(B, -1)
    l_x = h
    for (w, b) in dense_params:
        l_x = jnp.dot(h, w.T, precision=jax.lax.Precision.HIGHEST) + b
        h = jnp.maximum(l_x, 0.0)
    return jax.nn.log_softmax(l_x, axis=-1)


# ----------------------------------------------------------------------------
# Main
# ----------------------------------------------------------------------------
if __name__ == "__main__":
    B, L = 2, 128
    conv_layers = [1, 4, 8]          # Conv1d(1->4), Conv1d(4->8), kernel_size=10
    dense_layers = [200, 32, 10]     # flatten size: 8 channels * 25 positions = 200

    key = jax.random.PRNGKey(0)
    keys = jax.random.split(key, 1 + 2 * (len(conv_layers) - 1) + 2 * (len(dense_layers) - 1))
    ki = 0
    x = jax.random.normal(keys[ki], (B, L), dtype=jnp.float32); ki += 1

    conv_params = []
    for i in range(len(conv_layers) - 1):
        cin, cout = conv_layers[i], conv_layers[i + 1]
        w = jax.random.normal(keys[ki], (cout, cin, KERNEL_SIZE), jnp.float32)
        w = w * (1.0 / np.sqrt(cin * KERNEL_SIZE)); ki += 1
        b = 0.1 * jax.random.normal(keys[ki], (cout,), jnp.float32); ki += 1
        conv_params.append((w, b))

    dense_params = []
    for i in range(len(dense_layers) - 1):
        din, dout = dense_layers[i], dense_layers[i + 1]
        w = jax.random.normal(keys[ki], (dout, din), jnp.float32) * (1.0 / np.sqrt(din)); ki += 1
        b = 0.1 * jax.random.normal(keys[ki], (dout,), jnp.float32); ki += 1
        dense_params.append((w, b))

    # One-time parameter repack to kernel layout (folds flatten + dilation select
    # + sublane channel padding).
    conv_ws, conv_bs, dense_ws, dense_bs = prepare_params(conv_params, dense_params, L)

    # v7x has 2 TensorCores per chip: shard the batch over a parallel grid there;
    # on v5e/v6e keep a single fully fused grid step.
    num_blocks = 1
    try:
        if "7" in jax.devices()[0].device_kind.lower() and B >= 2 and B % 2 == 0:
            num_blocks = 2
    except Exception:
        num_blocks = 1

    out = simple_cnn_forward(x, conv_ws, conv_bs, dense_ws, dense_bs,
                             num_blocks=num_blocks)
    out = jax.block_until_ready(out)

    ref = reference_forward(x, conv_params, dense_params)
    assert out.shape == (B, dense_layers[-1])
    np.testing.assert_allclose(np.asarray(out), np.asarray(ref), rtol=2e-3, atol=2e-3)

    # TODO(synk): nn.BatchNorm1d(12) is declared in __init__ but never used in
    # forward(); it is intentionally not implemented.
    print("KERNEL_OK")
</pallas_src>

<mosaic_0001>
module attributes {stable_mosaic.version = 11 : i64} {
  func.func @kernel(%arg0: i32, %arg1: memref<1x2x128xf32, #tpu.memory_space<vmem>>, %arg2: memref<8x80xf32, #tpu.memory_space<vmem>>, %arg3: memref<8x1xf32, #tpu.memory_space<vmem>>, %arg4: memref<8x80xf32, #tpu.memory_space<vmem>>, %arg5: memref<8x1xf32, #tpu.memory_space<vmem>>, %arg6: memref<32x1024xf32, #tpu.memory_space<vmem>>, %arg7: memref<1x32xf32, #tpu.memory_space<vmem>>, %arg8: memref<10x32xf32, #tpu.memory_space<vmem>>, %arg9: memref<1x10xf32, #tpu.memory_space<vmem>>, %arg10: memref<1x2x10xf32, #tpu.memory_space<vmem>>) attributes {dimension_semantics = [#tpu.dimension_semantics<parallel>], iteration_bounds = array<i64: 1>, scalar_prefetch = 0 : i64, scratch_operands = 0 : i64, tpu.core_type = #tpu.core_type<tc>, window_params = [{transform_indices = @transform_0, window_bounds = array<i64: 1, 2, 128>}, {pipeline_mode = #tpu.pipeline_mode<synchronous>, transform_indices = @transform_1, window_bounds = array<i64: 8, 80>}, {pipeline_mode = #tpu.pipeline_mode<synchronous>, transform_indices = @transform_2, window_bounds = array<i64: 8, 1>}, {pipeline_mode = #tpu.pipeline_mode<synchronous>, transform_indices = @transform_3, window_bounds = array<i64: 8, 80>}, {pipeline_mode = #tpu.pipeline_mode<synchronous>, transform_indices = @transform_4, window_bounds = array<i64: 8, 1>}, {pipeline_mode = #tpu.pipeline_mode<synchronous>, transform_indices = @transform_5, window_bounds = array<i64: 32, 1024>}, {pipeline_mode = #tpu.pipeline_mode<synchronous>, transform_indices = @transform_6, window_bounds = array<i64: 1, 32>}, {pipeline_mode = #tpu.pipeline_mode<synchronous>, transform_indices = @transform_7, window_bounds = array<i64: 10, 32>}, {pipeline_mode = #tpu.pipeline_mode<synchronous>, transform_indices = @transform_8, window_bounds = array<i64: 1, 10>}, {transform_indices = @transform_9, window_bounds = array<i64: 1, 2, 10>}]} {
    %c0 = arith.constant 0 : index
    %c0_0 = arith.constant 0 : index
    %c0_1 = arith.constant 0 : index
    %0 = vector.load %arg1[%c0, %c0_0, %c0_1] : memref<1x2x128xf32, #tpu.memory_space<vmem>>, vector<1x2x128xf32>
    %1 = vector.shape_cast %0 : vector<1x2x128xf32> to vector<2x128xf32>
    %2 = vector.extract_strided_slice %1 {offsets = [0, 0], sizes = [1, 128], strides = [1, 1]} : vector<2x128xf32> to vector<1x128xf32>
    %3 = vector.extract_strided_slice %1 {offsets = [1, 0], sizes = [1, 128], strides = [1, 1]} : vector<2x128xf32> to vector<1x128xf32>
    %cst = arith.constant 0.000000e+00 : f32
    %4 = vector.broadcast %cst : f32 to vector<1x30xf32>
    %5 = tpu.concatenate %2, %3, %4 in 1 : vector<1x128xf32>, vector<1x128xf32>, vector<1x30xf32> -> vector<1x286xf32>
    %6 = vector.shape_cast %5 : vector<1x286xf32> to vector<1x286xf32>
    %7 = vector.broadcast %6 : vector<1x286xf32> to vector<8x286xf32>
    %8 = vector.extract_strided_slice %7 {offsets = [0, 0], sizes = [8, 277], strides = [1, 1]} : vector<8x286xf32> to vector<8x277xf32>
    %9 = vector.extract_strided_slice %7 {offsets = [0, 1], sizes = [8, 277], strides = [1, 1]} : vector<8x286xf32> to vector<8x277xf32>
    %10 = vector.extract_strided_slice %7 {offsets = [0, 2], sizes = [8, 277], strides = [1, 1]} : vector<8x286xf32> to vector<8x277xf32>
    %11 = vector.extract_strided_slice %7 {offsets = [0, 3], sizes = [8, 277], strides = [1, 1]} : vector<8x286xf32> to vector<8x277xf32>
    %12 = vector.extract_strided_slice %7 {offsets = [0, 4], sizes = [8, 277], strides = [1, 1]} : vector<8x286xf32> to vector<8x277xf32>
    %13 = vector.extract_strided_slice %7 {offsets = [0, 5], sizes = [8, 277], strides = [1, 1]} : vector<8x286xf32> to vector<8x277xf32>
    %14 = vector.extract_strided_slice %7 {offsets = [0, 6], sizes = [8, 277], strides = [1, 1]} : vector<8x286xf32> to vector<8x277xf32>
    %15 = vector.extract_strided_slice %7 {offsets = [0, 7], sizes = [8, 277], strides = [1, 1]} : vector<8x286xf32> to vector<8x277xf32>
    %16 = vector.extract_strided_slice %7 {offsets = [0, 8], sizes = [8, 277], strides = [1, 1]} : vector<8x286xf32> to vector<8x277xf32>
    %17 = vector.extract_strided_slice %7 {offsets = [0, 9], sizes = [8, 277], strides = [1, 1]} : vector<8x286xf32> to vector<8x277xf32>
    %18 = tpu.concatenate %8, %9, %10, %11, %12, %13, %14, %15, %16, %17 in 0 : vector<8x277xf32>, vector<8x277xf32>, vector<8x277xf32>, vector<8x277xf32>, vector<8x277xf32>, vector<8x277xf32>, vector<8x277xf32>, vector<8x277xf32>, vector<8x277xf32>, vector<8x277xf32> -> vector<80x277xf32>
    %c0_2 = arith.constant 0 : index
    %c0_3 = arith.constant 0 : index
    %19 = vector.load %arg2[%c0_2, %c0_3] : memref<8x80xf32, #tpu.memory_space<vmem>>, vector<8x80xf32>
    %cst_4 = arith.constant dense<0.000000e+00> : vector<8x277xf32>
    %20 = tpu.matmul %19, %18, %cst_4 {dimension_numbers = #tpu.dot_dimension_numbers<[1], [0], [0], [1], [0, 0, 1, 1], [], []>} : vector<8x80xf32>, vector<80x277xf32>, vector<8x277xf32> -> vector<8x277xf32>
    %c0_5 = arith.constant 0 : index
    %c0_6 = arith.constant 0 : index
    %21 = vector.load %arg3[%c0_5, %c0_6] : memref<8x1xf32, #tpu.memory_space<vmem>>, vector<8x1xf32>
    %22 = vector.broadcast %21 : vector<8x1xf32> to vector<8x277xf32>
    %23 = arith.addf %20, %22 : vector<8x277xf32>
    %cst_7 = arith.constant 0.000000e+00 : f32
    %24 = vector.broadcast %cst_7 : f32 to vector<8x277xf32>
    %25 = arith.maximumf %23, %24 : vector<8x277xf32>
    %26 = vector.extract_strided_slice %25 {offsets = [0, 0], sizes = [8, 276], strides = [1, 1]} : vector<8x277xf32> to vector<8x276xf32>
    %27 = vector.extract_strided_slice %25 {offsets = [0, 1], sizes = [8, 276], strides = [1, 1]} : vector<8x277xf32> to vector<8x276xf32>
    %28 = arith.maximumf %26, %27 : vector<8x276xf32>
    %29 = vector.extract_strided_slice %28 {offsets = [0, 0], sizes = [8, 258], strides = [1, 1]} : vector<8x276xf32> to vector<8x258xf32>
    %30 = vector.extract_strided_slice %28 {offsets = [0, 2], sizes = [8, 258], strides = [1, 1]} : vector<8x276xf32> to vector<8x258xf32>
    %31 = vector.extract_strided_slice %28 {offsets = [0, 4], sizes = [8, 258], strides = [1, 1]} : vector<8x276xf32> to vector<8x258xf32>
    %32 = vector.extract_strided_slice %28 {offsets = [0, 6], sizes = [8, 258], strides = [1, 1]} : vector<8x276xf32> to vector<8x258xf32>
    %33 = vector.extract_strided_slice %28 {offsets = [0, 8], sizes = [8, 258], strides = [1, 1]} : vector<8x276xf32> to vector<8x258xf32>
    %34 = vector.extract_strided_slice %28 {offsets = [0, 10], sizes = [8, 258], strides = [1, 1]} : vector<8x276xf32> to vector<8x258xf32>
    %35 = vector.extract_strided_slice %28 {offsets = [0, 12], sizes = [8, 258], strides = [1, 1]} : vector<8x276xf32> to vector<8x258xf32>
    %36 = vector.extract_strided_slice %28 {offsets = [0, 14], sizes = [8, 258], strides = [1, 1]} : vector<8x276xf32> to vector<8x258xf32>
    %37 = vector.extract_strided_slice %28 {offsets = [0, 16], sizes = [8, 258], strides = [1, 1]} : vector<8x276xf32> to vector<8x258xf32>
    %38 = vector.extract_strided_slice %28 {offsets = [0, 18], sizes = [8, 258], strides = [1, 1]} : vector<8x276xf32> to vector<8x258xf32>
    %39 = tpu.concatenate %29, %30, %31, %32, %33, %34, %35, %36, %37, %38 in 0 : vector<8x258xf32>, vector<8x258xf32>, vector<8x258xf32>, vector<8x258xf32>, vector<8x258xf32>, vector<8x258xf32>, vector<8x258xf32>, vector<8x258xf32>, vector<8x258xf32>, vector<8x258xf32> -> vector<80x258xf32>
    %c0_8 = arith.constant 0 : index
    %c0_9 = arith.constant 0 : index
    %40 = vector.load %arg4[%c0_8, %c0_9] : memref<8x80xf32, #tpu.memory_space<vmem>>, vector<8x80xf32>
    %cst_10 = arith.constant dense<0.000000e+00> : vector<8x258xf32>
    %41 = tpu.matmul %40, %39, %cst_10 {dimension_numbers = #tpu.dot_dimension_numbers<[1], [0], [0], [1], [0, 0, 1, 1], [], []>} : vector<8x80xf32>, vector<80x258xf32>, vector<8x258xf32> -> vector<8x258xf32>
    %c0_11 = arith.constant 0 : index
    %c0_12 = arith.constant 0 : index
    %42 = vector.load %arg5[%c0_11, %c0_12] : memref<8x1xf32, #tpu.memory_space<vmem>>, vector<8x1xf32>
    %43 = vector.broadcast %42 : vector<8x1xf32> to vector<8x258xf32>
    %44 = arith.addf %41, %43 : vector<8x258xf32>
    %cst_13 = arith.constant 0.000000e+00 : f32
    %45 = vector.broadcast %cst_13 : f32 to vector<8x258xf32>
    %46 = arith.maximumf %44, %45 : vector<8x258xf32>
    %47 = vector.extract_strided_slice %46 {offsets = [0, 0], sizes = [8, 256], strides = [1, 1]} : vector<8x258xf32> to vector<8x256xf32>
    %48 = vector.extract_strided_slice %46 {offsets = [0, 2], sizes = [8, 256], strides = [1, 1]} : vector<8x258xf32> to vector<8x256xf32>
    %49 = arith.maximumf %47, %48 : vector<8x256xf32>
    %50 = vector.extract_strided_slice %49 {offsets = [0, 0], sizes = [1, 128], strides = [1, 1]} : vector<8x256xf32> to vector<1x128xf32>
    %51 = vector.extract_strided_slice %49 {offsets = [1, 0], sizes = [1, 128], strides = [1, 1]} : vector<8x256xf32> to vector<1x128xf32>
    %52 = vector.extract_strided_slice %49 {offsets = [2, 0], sizes = [1, 128], strides = [1, 1]} : vector<8x256xf32> to vector<1x128xf32>
    %53 = vector.extract_strided_slice %49 {offsets = [3, 0], sizes = [1, 128], strides = [1, 1]} : vector<8x256xf32> to vector<1x128xf32>
    %54 = vector.extract_strided_slice %49 {offsets = [4, 0], sizes = [1, 128], strides = [1, 1]} : vector<8x256xf32> to vector<1x128xf32>
    %55 = vector.extract_strided_slice %49 {offsets = [5, 0], sizes = [1, 128], strides = [1, 1]} : vector<8x256xf32> to vector<1x128xf32>
    %56 = vector.extract_strided_slice %49 {offsets = [6, 0], sizes = [1, 128], strides = [1, 1]} : vector<8x256xf32> to vector<1x128xf32>
    %57 = vector.extract_strided_slice %49 {offsets = [7, 0], sizes = [1, 128], strides = [1, 1]} : vector<8x256xf32> to vector<1x128xf32>
    %58 = tpu.concatenate %50, %51, %52, %53, %54, %55, %56, %57 in 1 : vector<1x128xf32>, vector<1x128xf32>, vector<1x128xf32>, vector<1x128xf32>, vector<1x128xf32>, vector<1x128xf32>, vector<1x128xf32>, vector<1x128xf32> -> vector<1x1024xf32>
    %59 = vector.extract_strided_slice %49 {offsets = [0, 128], sizes = [1, 128], strides = [1, 1]} : vector<8x256xf32> to vector<1x128xf32>
    %60 = vector.extract_strided_slice %49 {offsets = [1, 128], sizes = [1, 128], strides = [1, 1]} : vector<8x256xf32> to vector<1x128xf32>
    %61 = vector.extract_strided_slice %49 {offsets = [2, 128], sizes = [1, 128], strides = [1, 1]} : vector<8x256xf32> to vector<1x128xf32>
    %62 = vector.extract_strided_slice %49 {offsets = [3, 128], sizes = [1, 128], strides = [1, 1]} : vector<8x256xf32> to vector<1x128xf32>
    %63 = vector.extract_strided_slice %49 {offsets = [4, 128], sizes = [1, 128], strides = [1, 1]} : vector<8x256xf32> to vector<1x128xf32>
    %64 = vector.extract_strided_slice %49 {offsets = [5, 128], sizes = [1, 128], strides = [1, 1]} : vector<8x256xf32> to vector<1x128xf32>
    %65 = vector.extract_strided_slice %49 {offsets = [6, 128], sizes = [1, 128], strides = [1, 1]} : vector<8x256xf32> to vector<1x128xf32>
    %66 = vector.extract_strided_slice %49 {offsets = [7, 128], sizes = [1, 128], strides = [1, 1]} : vector<8x256xf32> to vector<1x128xf32>
    %67 = tpu.concatenate %59, %60, %61, %62, %63, %64, %65, %66 in 1 : vector<1x128xf32>, vector<1x128xf32>, vector<1x128xf32>, vector<1x128xf32>, vector<1x128xf32>, vector<1x128xf32>, vector<1x128xf32>, vector<1x128xf32> -> vector<1x1024xf32>
    %68 = tpu.iota {dimensions = array<i32: 0>} : vector<2x1024xi32>
    %cst_14 = arith.constant 0.000000e+00 : f32
    %69 = vector.broadcast %cst_14 : f32 to vector<2x1024xf32>
    %c0_i32 = arith.constant 0 : i32
    %70 = vector.broadcast %c0_i32 : i32 to vector<2x1024xi32>
    %71 = arith.cmpi eq, %68, %70 : vector<2x1024xi32>
    %72 = vector.shape_cast %58 : vector<1x1024xf32> to vector<1x1024xf32>
    %73 = vector.broadcast %72 : vector<1x1024xf32> to vector<2x1024xf32>
    %74 = arith.select %71, %73, %69 : vector<2x1024xi1>, vector<2x1024xf32>
    %c1_i32 = arith.constant 1 : i32
    %75 = vector.broadcast %c1_i32 : i32 to vector<2x1024xi32>
    %76 = arith.cmpi eq, %68, %75 : vector<2x1024xi32>
    %77 = vector.shape_cast %67 : vector<1x1024xf32> to vector<1x1024xf32>
    %78 = vector.broadcast %77 : vector<1x1024xf32> to vector<2x1024xf32>
    %79 = arith.select %76, %78, %74 : vector<2x1024xi1>, vector<2x1024xf32>
    %c0_15 = arith.constant 0 : index
    %c0_16 = arith.constant 0 : index
    %80 = vector.load %arg6[%c0_15, %c0_16] : memref<32x1024xf32, #tpu.memory_space<vmem>>, vector<32x1024xf32>
    %cst_17 = arith.constant dense<0.000000e+00> : vector<2x32xf32>
    %81 = tpu.matmul %79, %80, %cst_17 {dimension_numbers = #tpu.dot_dimension_numbers<[1], [1], [0], [0], [0, 0, 1, 0], [], []>} : vector<2x1024xf32>, vector<32x1024xf32>, vector<2x32xf32> -> vector<2x32xf32>
    %c0_18 = arith.constant 0 : index
    %c0_19 = arith.constant 0 : index
    %82 = vector.load %arg7[%c0_18, %c0_19] : memref<1x32xf32, #tpu.memory_space<vmem>>, vector<1x32xf32>
    %83 = vector.broadcast %82 : vector<1x32xf32> to vector<2x32xf32>
    %84 = arith.addf %81, %83 : vector<2x32xf32>
    %cst_20 = arith.constant 0.000000e+00 : f32
    %85 = vector.broadcast %cst_20 : f32 to vector<2x32xf32>
    %86 = arith.maximumf %84, %85 : vector<2x32xf32>
    %c0_21 = arith.constant 0 : index
    %c0_22 = arith.constant 0 : index
    %87 = vector.load %arg8[%c0_21, %c0_22] : memref<10x32xf32, #tpu.memory_space<vmem>>, vector<10x32xf32>
    %cst_23 = arith.constant dense<0.000000e+00> : vector<2x10xf32>
    %88 = tpu.matmul %86, %87, %cst_23 {dimension_numbers = #tpu.dot_dimension_numbers<[1], [1], [0], [0], [0, 0, 1, 0], [], []>} : vector<2x32xf32>, vector<10x32xf32>, vector<2x10xf32> -> vector<2x10xf32>
    %c0_24 = arith.constant 0 : index
    %c0_25 = arith.constant 0 : index
    %89 = vector.load %arg9[%c0_24, %c0_25] : memref<1x10xf32, #tpu.memory_space<vmem>>, vector<1x10xf32>
    %90 = vector.broadcast %89 : vector<1x10xf32> to vector<2x10xf32>
    %91 = arith.addf %88, %90 : vector<2x10xf32>
    %cst_26 = arith.constant dense<0xFF800000> : vector<2xf32>
    %92 = vector.multi_reduction <maximumf>, %91, %cst_26 [1] : vector<2x10xf32> to vector<2xf32>
    %93 = vector.shape_cast %92 : vector<2xf32> to vector<2x1xf32>
    %94 = vector.broadcast %93 : vector<2x1xf32> to vector<2x10xf32>
    %95 = arith.subf %91, %94 : vector<2x10xf32>
    %96 = math.exp %95 : vector<2x10xf32>
    %cst_27 = arith.constant dense<0.000000e+00> : vector<2xf32>
    %97 = vector.multi_reduction <add>, %96, %cst_27 [1] : vector<2x10xf32> to vector<2xf32>
    %98 = vector.shape_cast %97 : vector<2xf32> to vector<2x1xf32>
    %99 = math.log %98 : vector<2x1xf32>
    %100 = vector.broadcast %99 : vector<2x1xf32> to vector<2x10xf32>
    %101 = arith.subf %95, %100 : vector<2x10xf32>
    %c0_28 = arith.constant 0 : index
    %c0_29 = arith.constant 0 : index
    %c0_30 = arith.constant 0 : index
    %102 = vector.load %arg10[%c0_28, %c0_29, %c0_30] : memref<1x2x10xf32, #tpu.memory_space<vmem>>, vector<1x2x10xf32>
    %103 = vector.shape_cast %102 : vector<1x2x10xf32> to vector<2x10xf32>
    %104 = vector.shape_cast %101 : vector<2x10xf32> to vector<1x2x10xf32>
    tpu.vector_store %arg10[%c0_28, %c0_29, %c0_30], %104 {strides = array<i32>} : memref<1x2x10xf32, #tpu.memory_space<vmem>>, vector<1x2x10xf32>,
    return
  }
  func.func @transform_0(%arg0: i32) -> (i32, i32, i32) {
    %c0_i32 = arith.constant 0 : i32
    %c0_i32_0 = arith.constant 0 : i32
    %c0_i32_1 = arith.constant 0 : i32
    return %arg0, %c0_i32, %c0_i32_0 : i32, i32, i32
  }
  func.func @transform_1(%arg0: i32) -> (i32, i32) {
    %c0_i32 = arith.constant 0 : i32
    %c0_i32_0 = arith.constant 0 : i32
    %c0_i32_1 = arith.constant 0 : i32
    return %c0_i32, %c0_i32_0 : i32, i32
  }
  func.func @transform_2(%arg0: i32) -> (i32, i32) {
    %c0_i32 = arith.constant 0 : i32
    %c0_i32_0 = arith.constant 0 : i32
    %c0_i32_1 = arith.constant 0 : i32
    return %c0_i32, %c0_i32_0 : i32, i32
  }
  func.func @transform_3(%arg0: i32) -> (i32, i32) {
    %c0_i32 = arith.constant 0 : i32
    %c0_i32_0 = arith.constant 0 : i32
    %c0_i32_1 = arith.constant 0 : i32
    return %c0_i32, %c0_i32_0 : i32, i32
  }
  func.func @transform_4(%arg0: i32) -> (i32, i32) {
    %c0_i32 = arith.constant 0 : i32
    %c0_i32_0 = arith.constant 0 : i32
    %c0_i32_1 = arith.constant 0 : i32
    return %c0_i32, %c0_i32_0 : i32, i32
  }
  func.func @transform_5(%arg0: i32) -> (i32, i32) {
    %c0_i32 = arith.constant 0 : i32
    %c0_i32_0 = arith.constant 0 : i32
    %c0_i32_1 = arith.constant 0 : i32
    return %c0_i32, %c0_i32_0 : i32, i32
  }
  func.func @transform_6(%arg0: i32) -> (i32, i32) {
    %c0_i32 = arith.constant 0 : i32
    %c0_i32_0 = arith.constant 0 : i32
    %c0_i32_1 = arith.constant 0 : i32
    return %c0_i32, %c0_i32_0 : i32, i32
  }
  func.func @transform_7(%arg0: i32) -> (i32, i32) {
    %c0_i32 = arith.constant 0 : i32
    %c0_i32_0 = arith.constant 0 : i32
    %c0_i32_1 = arith.constant 0 : i32
    return %c0_i32, %c0_i32_0 : i32, i32
  }
  func.func @transform_8(%arg0: i32) -> (i32, i32) {
    %c0_i32 = arith.constant 0 : i32
    %c0_i32_0 = arith.constant 0 : i32
    %c0_i32_1 = arith.constant 0 : i32
    return %c0_i32, %c0_i32_0 : i32, i32
  }
  func.func @transform_9(%arg0: i32) -> (i32, i32, i32) {
    %c0_i32 = arith.constant 0 : i32
    %c0_i32_0 = arith.constant 0 : i32
    %c0_i32_1 = arith.constant 0 : i32
    return %arg0, %c0_i32, %c0_i32_0 : i32, i32, i32
  }
}

</mosaic_0001>

<bundles_post_ra>
// kernel: simple_cnn_forward.1
= control target key start
LH: loop header
LB: loop body
LE: loop exit
PB: predicated region body
PF: predicated region fallthrough
CT: control target
= control target key end

     0   :  { %14 = vsyncpa [#allocation3], 0  ;;  %s1945_s0 = inlined_call_operand.hbm [shape: f32[1,2,128], index: 0, kind: input, shape index: {}]   ;;  %s1946_s1 = inlined_call_operand.vmem [shape: f32[8,80], index: 1, kind: input, shape index: {}]   ;;  %s1947_s2 = inlined_call_operand.vmem [shape: f32[8,1], index: 2, kind: input, shape index: {}]   ;;  %s1948_s3 = inlined_call_operand.vmem [shape: f32[8,80], index: 3, kind: input, shape index: {}]   ;;  %s1949_s4 = inlined_call_operand.vmem [shape: f32[8,1], index: 4, kind: input, shape index: {}]   ;;  %s1950_s5 = inlined_call_operand.hbm [shape: f32[32,1024], index: 5, kind: input, shape index: {}]   ;;  %s1951_s6 = inlined_call_operand.vmem [shape: f32[1,32], index: 6, kind: input, shape index: {}]   ;;  %s1952_s7 = inlined_call_operand.vmem [shape: f32[10,32], index: 7, kind: input, shape index: {}]   ;;  %s1953_s8 = inlined_call_operand.vmem [shape: f32[1,10], index: 8, kind: input, shape index: {}]   ;;  %s1954_s9 = inlined_call_operand.hbm [shape: f32[1,2,10], index: 9, kind: output, shape index: {}]  }
   0x1   :  { %15 = vsyncpa [#allocation6], 0 }
   0x2   :  { %16 = vsyncpa [#allocation4], 0  ;;  %s1586_s30 = smov [#allocation2]   ;;  %s1587_s11 = smov [#allocation5]  }
   0x3   :  { %s23_s10 = sshll.u32 %s1586_s30, 4  ;;  %s40_s12 = sshll.u32 %s1587_s11, 4  ;;  %s24_s10 = int_to_ptr.vmem [resolvable:$true] %s23_s10  ;;  %s1659_s12 = int_to_ptr.vmem [resolvable:$true] %s40_s12 }
   0x4   :  { %s1514_s15 = scalar_lea.hbm %s1945_s0, 32 }
   0x5   :  { %p1515_p0 = scmp.ne.s32.totalorder %s1945_s0, %s1514_s15  ;;  %p1518_p1 = scmp.lt.u32.totalorder %s1514_s15, %s1945_s0 }
   0x7   :  { %p1520_p2 = pnand %p1518_p1, %p1515_p0 }
   0x9   :  { %1523 = shalt.err (!%p1520_p2)
}
   0xa   :  { %s1524_s20 = scalar_lea.vmem %s24_s10, 32  ;;  %p1529_p4 = scmp.lt.s32.totalorder %s24_s10, %s24_s10 }
   0xb   :  { %p1525_p3 = scmp.ne.s32.totalorder %s24_s10, %s1524_s20  ;;  %p1530_p5 = scmp.lt.s32.totalorder %s1524_s20, %s1524_s20 }
   0xd   :  { %p1531_p6 = por %p1530_p5, %p1529_p4 }
   0xf   :  { %p1532_p7 = pnand %p1531_p6, %p1525_p3 }
  0x11   :  { %1535 = shalt.err (!%p1532_p7)
}
  0x12   :  { %26 = dma.hbm_to_vmem [thread:$0]  %s1945_s0, 32, %s24_s10, [#allocation3]  }
  0x13   :  { %s1536_s25 = scalar_lea.hbm %s1950_s5, 4096 }
  0x14   :  { %p1537_p8 = scmp.ne.s32.totalorder %s1950_s5, %s1536_s25  ;;  %p1540_p9 = scmp.lt.u32.totalorder %s1536_s25, %s1950_s5 }
  0x16   :  { %p1542_p10 = pnand %p1540_p9, %p1537_p8 }
  0x18   :  { %1545 = shalt.err (!%p1542_p10)
}
  0x19   :  { %s1546_s30 = scalar_lea.vmem %s1659_s12, 4096  ;;  %p1551_p12 = scmp.lt.s32.totalorder %s1659_s12, %s1659_s12 }
  0x1a   :  { %p1547_p11 = scmp.ne.s32.totalorder %s1659_s12, %s1546_s30  ;;  %p1552_p13 = scmp.lt.s32.totalorder %s1546_s30, %s1546_s30 }
  0x1c   :  { %p1553_p0 = por %p1552_p13, %p1551_p12 }
  0x1e   :  { %p1554_p1 = pnand %p1553_p0, %p1547_p11 }
  0x20   :  { %1557 = shalt.err (!%p1554_p1)
}
  0x21   :  { %s1588_s0 = smov 1024   ;;  %s1589_s10 = smov 64  }
  0x22   :  { %46 = dma.hbm_to_vmem [thread:$0]  %s1950_s5, 4096, %s1659_s12, [#allocation6], %s1588_s0, %s1588_s0, %s1589_s10  }
  0x23   :  { %1580 = dma.done.wait [#allocation3], 32  }
  0x24   :  { %1581 = vsyncadd [#allocation3], 4294967264 }
  0x25   :  { %1582 = dma.done.wait [#allocation6], 4096  }
  0x26   :  { %1583 = vsyncadd [#allocation6], 4294963200  ;;  %v63_v0 = vlaneseq  ;;  %v1590_v1 = vmov 0.0   ;;  %v59_v4 = vld [vmem:[#allocation2] sm:$0x3]  ;;  %s1591_s5 = smov 125  }
  0x27   :  { %260 = vmatprep.mubr.f32.mxu1 %v1590_v1  ;;  %538 = vmatprep.mubr.f32.mxu0 %v1590_v1  ;;  %v61_v6 = vrot.slane %v59_v4, 1  ;;  %s1592_s12 = smov 127   ;;  %s1593_s14 = smov 126   ;;  %v186_v9 = vld [vmem:[%s1947_s2] sm:$0xff]  ;;  %v1600_v10 = vmov 0   ;;  %vm95_vm0 = vcmask 1031168  }
  0x28   :  { %v1692_v2 = vshrl.u32 %v63_v0, 7  ;;  %s1594_s15 = smov 123   ;;  %s1595_s16 = smov 124   ;;  %1454 = vset.pattern.permute.xlu0 %v1600_v10  ;;  %vm83_vm1 = vcmask 1039360   ;;  %vm107_vm2 = vcmask 1022976   ;;  %vm131_vm3 = vcmask 1006592  }
  0x29   :  { %s1596_s17 = smov 121   ;;  %s1597_s18 = smov 122   ;;  %vm119_vm4 = vcmask 1014784   ;;  %vm155_vm5 = vcmask 990208   ;;  %vm143_vm6 = vcmask 998400   ;;  %vm179_vm7 = vcmask 973824  }
  0x2a   :  { %v1695_v3 = vsub.s32 0, %v1692_v2  ;;  %s1598_s19 = smov 119   ;;  %s1599_s20 = smov 120   ;;  %vm167_vm8 = vcmask 982016   ;;  %vm192_vm9 = vcmask 654336   ;;  %vm1602_vm10 = vmmov 0  }
  0x2b   :  { %s1604_s24 = smov 118   ;;  %s1605_s25 = smov 114   ;;  %vm410_vm11 = vcmask 965632   ;;  %vm422_vm12 = vcmask 949248   ;;  %vm434_vm13 = vcmask 932864   ;;  %vm446_vm14 = vcmask 916480  }
  0x2c   :  { %v1698_v5 = vrot.slane %v59_v4, %v1695_v3  ;;  %v70_v7 = vrot.slane %v61_v6, %v1695_v3  ;;  %s1606_s26 = smov 112   ;;  %s1607_s27 = smov 110   ;;  %vm458_vm15 = vcmask 900096  }
  0x2e   :  { %101 = vrot.lane.b32.xlu1 %v1698_v5, %s1591_s5  ;;  %77 = vrot.lane.b32.xlu0 %v1698_v5, %s1592_s12  ;;  %v1414_v8 = vpack.i.bf16 %v1590_v1, %v70_v7 }
  0x32   :  { %89 = vrot.lane.b32.xlu0 %v1698_v5, %s1593_s14  ;;  %1415 = vrot.lane.b32.xlu1 %v1414_v8, %s1593_s14 }
  0x36   :  { %1420 = vrot.lane.b32.xlu1 %v1414_v8, %s1591_s5  ;;  %1410 = vrot.lane.b32.xlu0 %v1414_v8, %s1592_s12 }
  0x3a   :  { %1430 = vrot.lane.b32.xlu1 %v1414_v8, %s1594_s15  ;;  %1425 = vrot.lane.b32.xlu0 %v1414_v8, %s1595_s16 }
  0x3e   :  { %125 = vrot.lane.b32.xlu1 %v1698_v5, %s1594_s15  ;;  %113 = vrot.lane.b32.xlu0 %v1698_v5, %s1595_s16 }
  0x42   :  { %1440 = vrot.lane.b32.xlu1 %v1414_v8, %s1596_s17  ;;  %1435 = vrot.lane.b32.xlu0 %v1414_v8, %s1597_s18 }
  0x46   :  { %149 = vrot.lane.b32.xlu1 %v1698_v5, %s1596_s17  ;;  %137 = vrot.lane.b32.xlu0 %v1698_v5, %s1597_s18 }
  0x4a   :  { %1450 = vrot.lane.b32.xlu1 %v1414_v8, %s1598_s19  ;;  %1445 = vrot.lane.b32.xlu0 %v1414_v8, %s1599_s20 }
  0x4e   :  { %173 = vrot.lane.b32.xlu1 %v1698_v5, %s1598_s19  ;;  %161 = vrot.lane.b32.xlu0 %v1698_v5, %s1599_s20 }
  0x52   :  { %189 = vperm.xlu0 %1454, %v186_v9  }
  0xa0   :  { %v102_v11 = vpop.permute.xlu1 %101  ;;  %v78_v12 = vpop.permute.xlu0 %77 }
  0xa4   :  { %v90_v13 = vpop.permute.xlu0 %89  ;;  %v1724_v14 = vpop.permute.xlu1 %1415 }
  0xa5   :  { %v1418_v15 = vunpack.i.h.bf16 %v1724_v14  ;;  %v1417_v16 = vunpack.i.l.bf16 %v1724_v14 }
  0xa7   :  { %v97_v29 = vsel %vm95_vm0, %v1417_v16, %v1418_v15  ;;  %v96_v41 = vsel %vm95_vm0, %v90_v13, %v1417_v16  ;;  %v185_v16 = vld [vmem:[%s1946_s1] sm:$0xff]  ;;  %s1603_s1 = smov 116  }
  0xa8   :  { %v1728_v17 = vpop.permute.xlu1 %1420  ;;  %v1730_v18 = vpop.permute.xlu0 %1410 }
  0xa9   :  { %v1423_v19 = vunpack.i.h.bf16 %v1728_v17  ;;  %v1422_v20 = vunpack.i.l.bf16 %v1728_v17  ;;  %v1413_v21 = vunpack.i.h.bf16 %v1730_v18  ;;  %v1412_v22 = vunpack.i.l.bf16 %v1730_v18 }
  0xab   :  { %v85_v23 = vsel %vm83_vm1, %v1412_v22, %v1413_v21  ;;  %v84_v24 = vsel %vm83_vm1, %v78_v12, %v1412_v22  ;;  %v109_v30 = vsel %vm107_vm2, %v1422_v20, %v1423_v19  ;;  %v108_v36 = vsel %vm107_vm2, %v102_v11, %v1422_v20 }
  0xac   :  { %v1740_v25 = vpop.permute.xlu1 %1430  ;;  %v1742_v26 = vpop.permute.xlu0 %1425  ;;  %v1273_v27 = vpack.c.bf16 %v85_v23, %v70_v7  ;;  %v1275_v28 = vpack.c.bf16 %v84_v24, %v1698_v5  ;;  %v1277_v35 = vpack.c.bf16 %v109_v30, %v97_v29  ;;  %v1279_v44 = vpack.c.bf16 %v108_v36, %v96_v41 }
  0xad   :  { %v1433_v31 = vunpack.i.h.bf16 %v1740_v25  ;;  %v1432_v32 = vunpack.i.l.bf16 %v1740_v25  ;;  %v1428_v33 = vunpack.i.h.bf16 %v1742_v26  ;;  %v1427_v34 = vunpack.i.l.bf16 %v1742_v26 }
  0xae   :  { %1274 = vmatprep.subr.bf16.mxu1 %v1273_v27  ;;  %v1601_v20 = vmov 0.0|0.0   ;;  %v1294_v22 = vpack.c.bf16 %v1413_v21, %v1590_v1  ;;  %v1297_v23 = vpack.c.bf16 %v1423_v19, %v1418_v15 }
  0xaf   :  { %1276 = vmatpush1.bf16.msra.mxu1 %v1275_v28  ;;  %v121_v37 = vsel %vm119_vm4, %v1427_v34, %v1428_v33  ;;  %v133_v38 = vsel %vm131_vm3, %v1432_v32, %v1433_v31  ;;  %v1300_v18 = vpack.c.bf16 %v1433_v31, %v1428_v33 }
  0xb0   :  { %v126_v39 = vpop.permute.xlu1 %125  ;;  %v114_v40 = vpop.permute.xlu0 %113  ;;  %1278 = vmatprep.subr.bf16.mxu1 %v1277_v35  ;;  %v1281_v45 = vpack.c.bf16 %v133_v38, %v121_v37 }
  0xb1   :  { %v132_v42 = vsel %vm131_vm3, %v126_v39, %v1432_v32  ;;  %v120_v43 = vsel %vm119_vm4, %v114_v40, %v1427_v34  ;;  %vm665_vm3 = vcmp.eq.s32.totalorder %v1692_v2, 0 }
  0xb2   :  { %v1283_v46 = vpack.c.bf16 %v132_v42, %v120_v43  ;;  %v465_v43 = vld [vmem:[%s1949_s4] sm:$0xff] }
  0xb3   :  { %1280 = vmatpush1.bf16.msra.mxu1 %v1279_v44 }
  0xb4   :  { %v1441_v47 = vpop.permute.xlu1 %1440  ;;  %v1436_v48 = vpop.permute.xlu0 %1435  ;;  %1282 = vmatprep.subr.bf16.mxu1 %v1281_v45 }
  0xb5   :  { %v1443_v49 = vunpack.i.h.bf16 %v1441_v47  ;;  %v1442_v50 = vunpack.i.l.bf16 %v1441_v47  ;;  %v1438_v51 = vunpack.i.h.bf16 %v1436_v48  ;;  %v1437_v52 = vunpack.i.l.bf16 %v1436_v48 }
  0xb7   :  { %1284 = vmatpush1.bf16.msra.mxu1 %v1283_v46  ;;  %v145_v53 = vsel %vm143_vm6, %v1437_v52, %v1438_v51  ;;  %v157_v54 = vsel %vm155_vm5, %v1442_v50, %v1443_v49  ;;  %v1303_v21 = vpack.c.bf16 %v1443_v49, %v1438_v51 }
  0xb8   :  { %v150_v55 = vpop.permute.xlu1 %149  ;;  %v138_v56 = vpop.permute.xlu0 %137  ;;  %v1285_v57 = vpack.c.bf16 %v157_v54, %v145_v53 }
  0xb9   :  { %v156_v58 = vsel %vm155_vm5, %v150_v55, %v1442_v50  ;;  %v144_v59 = vsel %vm143_vm6, %v138_v56, %v1437_v52 }
  0xba   :  { %v1287_v60 = vpack.c.bf16 %v156_v58, %v144_v59  ;;  %1286 = vmatprep.subr.bf16.mxu1 %v1285_v57 }
  0xbc   :  { %v1451_v61 = vpop.permute.xlu1 %1450  ;;  %v1446_v62 = vpop.permute.xlu0 %1445  ;;  %1288 = vmatpush1.bf16.msra.mxu1 %v1287_v60 }
  0xbd   :  { %v1453_v63 = vunpack.i.h.bf16 %v1451_v61  ;;  %v1452_v0 = vunpack.i.l.bf16 %v1451_v61  ;;  %v1448_v4 = vunpack.i.h.bf16 %v1446_v62  ;;  %v1447_v5 = vunpack.i.l.bf16 %v1446_v62 }
  0xbf   :  { %v169_v6 = vsel %vm167_vm8, %v1447_v5, %v1448_v4  ;;  %v181_v7 = vsel %vm179_vm7, %v1452_v0, %v1453_v63  ;;  %v1306_v24 = vpack.c.bf16 %v1453_v63, %v1448_v4 }
  0xc0   :  { %v174_v8 = vpop.permute.xlu1 %173  ;;  %v162_v9 = vpop.permute.xlu0 %161  ;;  %v1289_v10 = vpack.c.bf16 %v181_v7, %v169_v6 }
  0xc1   :  { %v180_v11 = vsel %vm179_vm7, %v174_v8, %v1452_v0  ;;  %v168_v12 = vsel %vm167_vm8, %v162_v9, %v1447_v5 }
  0xc2   :  { %v1291_v13 = vpack.c.bf16 %v180_v11, %v168_v12  ;;  %1290 = vmatprep.subr.bf16.mxu1 %v1289_v10 }
  0xc4   :  { %1292 = vmatpush1.bf16.msra.mxu1 %v1291_v13 }
  0xc5   :  { %1293 = vmatprep.subr.bf16.mxu1 %v1601_v20 }
  0xc7   :  { %1186 = vmatmul.mubr.msk.f32.vlgmr.msra.gmra.mrb[0].mxu1 %vm192_vm9, %v185_v16 }
  0xc8   :  { %1295 = vmatpush3.bf16.msra.mxu1 %v1294_v22  ;;  %1240 = vmatprep.mubr.msk.f32.mxu1 %vm1602_vm10, %v1590_v1 }
  0xc9   :  { %1296 = vmatprep.subr.bf16.mxu1 %v1601_v20 }
  0xcc   :  { %1298 = vmatpush3.bf16.msra.mxu1 %v1297_v23 }
  0xcd   :  { %1299 = vmatprep.subr.bf16.mxu1 %v1601_v20 }
  0xd0   :  { %1301 = vmatpush3.bf16.msra.mxu1 %v1300_v18 }
  0xd1   :  { %1302 = vmatprep.subr.bf16.mxu1 %v1601_v20  ;;  %v190_v17 = vpop.permute.xlu0 %189 }
  0xd4   :  { %1304 = vmatpush3.bf16.msra.mxu1 %v1303_v21 }
  0xd5   :  { %1305 = vmatprep.subr.bf16.mxu1 %v1601_v20 }
  0xd8   :  { %1307 = vmatpush3.bf16.msra.mxu1 %v1306_v24 }
  0xd9   :  { %1328 = vmatprep.subr.bf16.mxu1 %v1601_v20 }
  0xdb   :  { %1241 = vmatmul.mubr.msk.f32.vlgmr.msra.gmra.mrb[2].mxu1 %vm192_vm9, %v185_v16 }
  0xdc   :  { %1263 = vmatprep.mubr.msk.f32.mxu1 %vm1602_vm10, %v1590_v1 }
 0x19a   :  { %v262_v14 = vpop.f32.mrb[0].mxu1 }
 0x19b   :  { %v264_v15 = vpop.f32.mrb[1].mxu1  ;;  %v263_v30 = vadd.f32 %v262_v14, %v190_v17 }
 0x19c   :  { %v265_v19 = vadd.f32 %v264_v15, %v190_v17 }
 0x19d   :  { %v337_v32 = vmax.f32 %v263_v30, 0.0 }
 0x19e   :  { %v338_v28 = vmax.f32 %v265_v19, 0.0 }
 0x1ae   :  { %v333_v25 = vpop.f32.mrb[2].mxu1 }
 0x1af   :  { %v334_v26 = vadd.f32 %v333_v25, %v190_v17  ;;  %v1242_v27 = vpop.f32.mrb[3].mxu1 }
 0x1b1   :  { %v339_v29 = vmax.f32 %v334_v26, 0.0 }
 0x1b3   :  { %v1455_v31 = vpack.i.bf16 %v339_v29, %v338_v28 }
 0x1b5   :  { %1456 = vrot.lane.b32.xlu1 %v1455_v31, %s1592_s12 }
 0x1b9   :  { %343 = vrot.lane.b32.xlu1 %v337_v32, %s1592_s12 }
 0x227   :  { %v1457_v33 = vpop.permute.xlu1 %1456 }
 0x228   :  { %v1458_v34 = vunpack.i.l.bf16 %v1457_v33  ;;  %v1459_v38 = vunpack.i.h.bf16 %v1457_v33 }
 0x22a   :  { %v350_v39 = vsel %vm83_vm1, %v1458_v34, %v1459_v38  ;;  %v356_v40 = vmax.f32 %v339_v29, %v1459_v38 }
 0x22b   :  { %v344_v35 = vpop.permute.xlu1 %343  ;;  %v355_v41 = vmax.f32 %v338_v28, %v350_v39 }
 0x22c   :  { %v349_v36 = vsel %vm83_vm1, %v344_v35, %v1458_v34  ;;  %vm1076_vm1 = vcmask 261120  }
 0x22d   :  { %v354_v37 = vmax.f32 %v337_v32, %v349_v36  ;;  %v1460_v42 = vpack.i.bf16 %v356_v40, %v355_v41  ;;  %vm1377_vm2 = vmpackc.low %vm1076_vm1, %vm1076_vm1 }
 0x22f   :  { %371 = vrot.lane.b32.xlu0 %v354_v37, %s1595_s16  ;;  %360 = vrot.lane.b32.xlu1 %v354_v37, %s1593_s14 }
 0x233   :  { %393 = vrot.lane.b32.xlu0 %v354_v37, %s1599_s20  ;;  %382 = vrot.lane.b32.xlu1 %v354_v37, %s1597_s18 }
 0x237   :  { %416 = vrot.lane.b32.xlu0 %v354_v37, %s1603_s1  ;;  %404 = vrot.lane.b32.xlu1 %v354_v37, %s1604_s24 }
 0x23b   :  { %1461 = vrot.lane.b32.xlu0 %v1460_v42, %s1593_s14  ;;  %428 = vrot.lane.b32.xlu1 %v354_v37, %s1605_s25 }
 0x23f   :  { %1466 = vrot.lane.b32.xlu0 %v1460_v42, %s1595_s16  ;;  %1471 = vrot.lane.b32.xlu1 %v1460_v42, %s1597_s18 }
 0x243   :  { %1476 = vrot.lane.b32.xlu0 %v1460_v42, %s1599_s20  ;;  %1481 = vrot.lane.b32.xlu1 %v1460_v42, %s1604_s24 }
 0x247   :  { %1486 = vrot.lane.b32.xlu0 %v1460_v42, %s1603_s1  ;;  %1491 = vrot.lane.b32.xlu1 %v1460_v42, %s1605_s25 }
 0x24b   :  { %1496 = vrot.lane.b32.xlu0 %v1460_v42, %s1606_s26  ;;  %1501 = vrot.lane.b32.xlu1 %v1460_v42, %s1607_s27 }
 0x24f   :  { %440 = vrot.lane.b32.xlu0 %v354_v37, %s1606_s26  ;;  %452 = vrot.lane.b32.xlu1 %v354_v37, %s1607_s27 }
 0x253   :  { %468 = vperm.xlu0 %1454, %v465_v43  }
 0x2a1   :  { %v372_v44 = vpop.permute.xlu0 %371  ;;  %v361_v45 = vpop.permute.xlu1 %360 }
 0x2a5   :  { %v394_v46 = vpop.permute.xlu0 %393  ;;  %v383_v47 = vpop.permute.xlu1 %382 }
 0x2a9   :  { %v417_v48 = vpop.permute.xlu0 %416  ;;  %v405_v49 = vpop.permute.xlu1 %404 }
 0x2ad   :  { %v1462_v50 = vpop.permute.xlu0 %1461  ;;  %v1810_v51 = vpop.permute.xlu1 %428 }
 0x2ae   :  { %v1464_v52 = vunpack.i.h.bf16 %v1462_v50  ;;  %v1463_v53 = vunpack.i.l.bf16 %v1462_v50 }
 0x2b0   :  { %v1329_v54 = vpack.c.bf16 %v1464_v52, %v356_v40  ;;  %v367_v55 = vsel %vm95_vm0, %v1463_v53, %v1464_v52  ;;  %v366_v56 = vsel %vm95_vm0, %v361_v45, %v1463_v53  ;;  %v464_v52 = vld [vmem:[%s1948_s3] sm:$0xff] }
 0x2b1   :  { %v1467_v57 = vpop.permute.xlu0 %1466  ;;  %v1472_v58 = vpop.permute.xlu1 %1471  ;;  %v1308_v59 = vpack.c.bf16 %v367_v55, %v355_v41  ;;  %v1310_v60 = vpack.c.bf16 %v366_v56, %v354_v37  ;;  %v756_v55 = vld [vmem:[#allocation5 + $0x48] sm:$0xff]  ;;  %v747_v56 = vld [vmem:[#allocation5] sm:$0xff] }
 0x2b2   :  { %v1469_v61 = vunpack.i.h.bf16 %v1467_v57  ;;  %v1468_v62 = vunpack.i.l.bf16 %v1467_v57  ;;  %v1474_v63 = vunpack.i.h.bf16 %v1472_v58  ;;  %v1473_v0 = vunpack.i.l.bf16 %v1472_v58  ;;  %1330 = vmatpush3.bf16.msra.mxu1 %v1329_v54  ;;  %v748_v54 = vld [vmem:[#allocation5 + $0x8] sm:$0xff]  ;;  %v755_v58 = vld [vmem:[#allocation5 + $0x40] sm:$0xff] }
 0x2b3   :  { %1309 = vmatprep.subr.bf16.mxu0 %v1308_v59  ;;  %1331 = vmatprep.subr.bf16.mxu1 %v1601_v20  ;;  %v1343_v57 = vpack.c.bf16 %v756_v55, %v748_v54  ;;  %v1345_v59 = vpack.c.bf16 %v755_v58, %v747_v56  ;;  %v752_v54 = vld [vmem:[#allocation5 + $0x28] sm:$0xff] }
 0x2b4   :  { %v1332_v4 = vpack.c.bf16 %v1474_v63, %v1469_v61  ;;  %1311 = vmatpush1.bf16.msra.mxu0 %v1310_v60  ;;  %v378_v5 = vsel %vm119_vm4, %v1468_v62, %v1469_v61  ;;  %v389_v6 = vsel %vm143_vm6, %v1473_v0, %v1474_v63  ;;  %v377_v7 = vsel %vm119_vm4, %v372_v44, %v1468_v62  ;;  %v764_v62 = vld [vmem:[#allocation5 + $0x88] sm:$0xff] }
 0x2b5   :  { %v1477_v8 = vpop.permute.xlu0 %1476  ;;  %v1482_v9 = vpop.permute.xlu1 %1481  ;;  %v1312_v10 = vpack.c.bf16 %v389_v6, %v378_v5  ;;  %v388_v11 = vsel %vm143_vm6, %v383_v47, %v1473_v0  ;;  %v763_v5 = vld [vmem:[#allocation5 + $0x80] sm:$0xff]  ;;  %v760_v55 = vld [vmem:[#allocation5 + $0x68] sm:$0xff]  ;;  %vm1156_vm4 = vcmask 74752  }
 0x2b6   :  { %v1479_v12 = vunpack.i.h.bf16 %v1477_v8  ;;  %v1478_v13 = vunpack.i.l.bf16 %v1477_v8  ;;  %v1484_v16 = vunpack.i.h.bf16 %v1482_v9  ;;  %v1483_v22 = vunpack.i.l.bf16 %v1482_v9  ;;  %1333 = vmatpush3.bf16.msra.mxu1 %v1332_v4  ;;  %v771_v6 = vld [vmem:[#allocation5 + $0xc0] sm:$0xff] }
 0x2b7   :  { %1313 = vmatprep.subr.bf16.mxu0 %v1312_v10  ;;  %v1314_v23 = vpack.c.bf16 %v388_v11, %v377_v7  ;;  %1334 = vmatprep.subr.bf16.mxu1 %v1601_v20 }
 0x2b8   :  { %v1335_v18 = vpack.c.bf16 %v1484_v16, %v1479_v12  ;;  %v400_v21 = vsel %vm167_vm8, %v1478_v13, %v1479_v12  ;;  %v412_v24 = vsel %vm410_vm11, %v1483_v22, %v1484_v16  ;;  %v399_v14 = vsel %vm167_vm8, %v394_v46, %v1478_v13  ;;  %v750_v16 = vld [vmem:[#allocation5 + $0x18] sm:$0xff] }
 0x2b9   :  { %1315 = vmatpush1.bf16.msra.mxu0 %v1314_v23  ;;  %v1487_v15 = vpop.permute.xlu0 %1486  ;;  %v1492_v17 = vpop.permute.xlu1 %1491  ;;  %v1316_v19 = vpack.c.bf16 %v412_v24, %v400_v21  ;;  %v411_v25 = vsel %vm410_vm11, %v405_v49, %v1483_v22  ;;  %v758_v22 = vld [vmem:[#allocation5 + $0x58] sm:$0xff]  ;;  %v1068_v24 = vld [vmem:[%s1952_s7 + $0x8] sm:$0x3] }
 0x2ba   :  { %v1489_v26 = vunpack.i.h.bf16 %v1487_v15  ;;  %v1488_v27 = vunpack.i.l.bf16 %v1487_v15  ;;  %v1494_v28 = vunpack.i.h.bf16 %v1492_v17  ;;  %v1493_v29 = vunpack.i.l.bf16 %v1492_v17  ;;  %1336 = vmatpush3.bf16.msra.mxu1 %v1335_v18  ;;  %v1067_v21 = vld [vmem:[%s1952_s7] sm:$0xff] }
 0x2bb   :  { %1317 = vmatprep.subr.bf16.mxu0 %v1316_v19  ;;  %v1318_v30 = vpack.c.bf16 %v411_v25, %v399_v14  ;;  %1337 = vmatprep.subr.bf16.mxu1 %v1601_v20  ;;  %v1351_v18 = vpack.c.bf16 %v758_v22, %v750_v16  ;;  %v1376_v14 = vpack.c.bf16 %v1068_v24, %v1067_v21  ;;  %v775_v16 = vld [vmem:[#allocation5 + $0xe0] sm:$0xff]  ;;  %v754_v22 = vld [vmem:[#allocation5 + $0x38] sm:$0xff] }
 0x2bc   :  { %v1338_v31 = vpack.c.bf16 %v1494_v28, %v1489_v26  ;;  %v424_v32 = vsel %vm422_vm12, %v1488_v27, %v1489_v26  ;;  %v436_v33 = vsel %vm434_vm13, %v1493_v29, %v1494_v28  ;;  %v423_v34 = vsel %vm422_vm12, %v417_v48, %v1488_v27 }
 0x2bd   :  { %1319 = vmatpush1.bf16.msra.mxu0 %v1318_v30  ;;  %v1497_v35 = vpop.permute.xlu0 %1496  ;;  %v1502_v36 = vpop.permute.xlu1 %1501  ;;  %v1320_v37 = vpack.c.bf16 %v436_v33, %v424_v32  ;;  %v435_v38 = vsel %vm434_vm13, %v1810_v51, %v1493_v29  ;;  %v749_v33 = vld [vmem:[#allocation5 + $0x10] sm:$0xff] }
 0x2be   :  { %v1499_v39 = vunpack.i.h.bf16 %v1497_v35  ;;  %v1498_v40 = vunpack.i.l.bf16 %v1497_v35  ;;  %v1504_v41 = vunpack.i.h.bf16 %v1502_v36  ;;  %v1503_v42 = vunpack.i.l.bf16 %v1502_v36  ;;  %1339 = vmatpush3.bf16.msra.mxu1 %v1338_v31 }
 0x2bf   :  { %1321 = vmatprep.subr.bf16.mxu0 %v1320_v37  ;;  %v1322_v43 = vpack.c.bf16 %v435_v38, %v423_v34  ;;  %1340 = vmatprep.subr.bf16.mxu1 %v1601_v20  ;;  %v757_v34 = vld [vmem:[#allocation5 + $0x50] sm:$0xff] }
 0x2c0   :  { %v1341_v44 = vpack.c.bf16 %v1504_v41, %v1499_v39  ;;  %v448_v45 = vsel %vm446_vm14, %v1498_v40, %v1499_v39  ;;  %v460_v46 = vsel %vm458_vm15, %v1503_v42, %v1504_v41  ;;  %v774_v41 = vld [vmem:[#allocation5 + $0xd8] sm:$0xff] }
 0x2c1   :  { %1323 = vmatpush1.bf16.msra.mxu0 %v1322_v43  ;;  %v441_v47 = vpop.permute.xlu0 %440  ;;  %v453_v48 = vpop.permute.xlu1 %452  ;;  %v1324_v49 = vpack.c.bf16 %v460_v46, %v448_v45  ;;  %v1353_v46 = vpack.c.bf16 %v757_v34, %v749_v33 }
 0x2c2   :  { %v447_v50 = vsel %vm446_vm14, %v441_v47, %v1498_v40  ;;  %v459_v51 = vsel %vm458_vm15, %v453_v48, %v1503_v42  ;;  %1342 = vmatpush3.bf16.msra.mxu1 %v1341_v44  ;;  %v766_v40 = vld [vmem:[#allocation5 + $0x98] sm:$0xff] }
 0x2c3   :  { %v1326_v53 = vpack.c.bf16 %v459_v51, %v447_v50  ;;  %1325 = vmatprep.subr.bf16.mxu0 %v1324_v49  ;;  %1375 = vmatprep.subr.bf16.mxu1 %v1601_v20  ;;  %v772_v20 = vld [vmem:[#allocation5 + $0xc8] sm:$0xff]  ;;  %v1355_v49 = vpack.c.bf16 %v774_v41, %v766_v40  ;;  %v769_v40 = vld [vmem:[#allocation5 + $0xb0] sm:$0xff] }
 0x2c4   :  { %v1347_v4 = vpack.c.bf16 %v772_v20, %v764_v62  ;;  %v777_v41 = vld [vmem:[#allocation5 + $0xf0] sm:$0xff] }
 0x2c5   :  { %1327 = vmatpush1.bf16.msra.mxu0 %v1326_v53  ;;  %1264 = vmatmul.mubr.msk.f32.vlgmr.msra.gmra.mrb[4].mxu1 %vm192_vm9, %v464_v52  ;;  %v773_v53 = vld [vmem:[#allocation5 + $0xd0] sm:$0xff] }
 0x2c6   :  { %1270 = vmatprep.mubr.msk.f32.mxu1 %vm1602_vm10, %v1590_v1  ;;  %1344 = vmatprep.subr.bf16.mxu0 %v1343_v57  ;;  %v1349_v1 = vpack.c.bf16 %v771_v6, %v763_v5  ;;  %v768_v5 = vld [vmem:[#allocation5 + $0xa8] sm:$0xff] }
 0x2c7   :  { %v776_v6 = vld [vmem:[#allocation5 + $0xe8] sm:$0xff] }
 0x2c8   :  { %1188 = vmatmul.mubr.msk.f32.vlgmr.msra.gmra.mrb[0].mxu0 %vm192_vm9, %v464_v52  ;;  %v765_v52 = vld [vmem:[#allocation5 + $0x90] sm:$0xff] }
 0x2c9   :  { %v1357_v57 = vpack.c.bf16 %v773_v53, %v765_v52 }
 0x2cb   :  { %1378 = vmatpush3.bf16.xpose.msk.msra.mxu1 %vm1377_vm2, %v1376_v14 }
 0x2ce   :  { %1346 = vmatpush1.bf16.xpose.msra.mxu0 %v1345_v59  ;;  %v1359_v59 = vpack.c.bf16 %v760_v55, %v752_v54 }
 0x2cf   :  { %1348 = vmatprep.subr.bf16.mxu0 %v1347_v4 }
 0x2d2   :  { %v469_v60 = vpop.permute.xlu0 %468 }
 0x2d6   :  { %1350 = vmatpush1.bf16.xpose.msra.mxu0 %v1349_v1 }
 0x2d7   :  { %1352 = vmatprep.subr.bf16.mxu0 %v1351_v18 }
 0x398   :  { %v611_v61 = vpop.f32.mrb[4].mxu1 }
 0x399   :  { %v612_v63 = vadd.f32 %v611_v61, %v469_v60  ;;  %v1265_v0 = vpop.f32.mrb[5].mxu1 }
 0x39a   :  { %v759_v0 = vld [vmem:[#allocation5 + $0x60] sm:$0xff] }
 0x39b   :  { %v617_v7 = vmax.f32 %v612_v63, 0.0  ;;  %v540_v8 = vpop.f32.mrb[0].mxu0  ;;  %v751_v63 = vld [vmem:[#allocation5 + $0x20] sm:$0xff] }
 0x39c   :  { %v541_v9 = vadd.f32 %v540_v8, %v469_v60  ;;  %v542_v10 = vpop.f32.mrb[1].mxu0  ;;  %v1361_v8 = vpack.c.bf16 %v759_v0, %v751_v63 }
 0x39d   :  { %v543_v11 = vadd.f32 %v542_v10, %v469_v60  ;;  %625 = vrot.lane.b32.xlu0 %v617_v7, %s1593_s14  ;;  %v1363_v10 = vpack.c.bf16 %v776_v6, %v768_v5 }
 0x39e   :  { %v615_v12 = vmax.f32 %v541_v9, 0.0 }
 0x39f   :  { %v616_v13 = vmax.f32 %v543_v11, 0.0 }
 0x3a1   :  { %v1505_v23 = vpack.i.bf16 %v616_v13, %v615_v12 }
 0x3a3   :  { %1506 = vrot.lane.b32.xlu1 %v1505_v23, %s1593_s14  ;;  %v762_v23 = vld [vmem:[#allocation5 + $0x78] sm:$0xff] }
 0x3a4   :  { %v1367_v14 = vpack.c.bf16 %v762_v23, %v754_v22 }
 0x40f   :  { %v626_v25 = vpop.permute.xlu0 %625 }
 0x415   :  { %v1507_v15 = vpop.permute.xlu1 %1506 }
 0x416   :  { %v1509_v17 = vunpack.i.h.bf16 %v1507_v15  ;;  %v1508_v19 = vunpack.i.l.bf16 %v1507_v15 }
 0x418   :  { %v628_v26 = vsel %vm95_vm0, %v1509_v17, %v626_v25  ;;  %v627_v27 = vsel %vm95_vm0, %v1508_v19, %v1509_v17  ;;  %vm706_vm0 = vcmp.eq.s32.totalorder %v1692_v2, 1 }
 0x419   :  { %v1853_v28 = vmax.f32 %v616_v13, %v628_v26  ;;  %v1855_v29 = vmax.f32 %v615_v12, %v627_v27  ;;  %v767_v13 = vld [vmem:[#allocation5 + $0xa0] sm:$0xff]  ;;  %v753_v26 = vld [vmem:[#allocation5 + $0x30] sm:$0xff] }
 0x41a   :  { %v1365_v21 = vpack.c.bf16 %v775_v16, %v767_v13  ;;  %v761_v27 = vld [vmem:[#allocation5 + $0x70] sm:$0xff] }
 0x41b   :  { %v634_v30 = vrot.slane %v1855_v29, 1  ;;  %v649_v31 = vrot.slane %v1853_v28, 1  ;;  %v669_v32 = vrot.slane %v1855_v29, %v1695_v3  ;;  %v638_v35 = vrot.slane %v1855_v29, 3 }
 0x41c   :  { %v653_v36 = vrot.slane %v1853_v28, 3  ;;  %v710_v39 = vrot.slane %v1853_v28, %v1695_v3  ;;  %v636_v56 = vrot.slane %v1855_v29, 2  ;;  %v642_v58 = vrot.slane %v1855_v29, 5 }
 0x41d   :  { %v673_v37 = vrot.slane %v634_v30, %v1695_v3  ;;  %v714_v38 = vrot.slane %v649_v31, %v1695_v3  ;;  %v698_v42 = vsel %vm665_vm3, %v669_v32, 0.0  ;;  %v681_v43 = vrot.slane %v638_v35, %v1695_v3  ;;  %v770_v31 = vld [vmem:[#allocation5 + $0xb8] sm:$0xff] }
 0x41e   :  { %v722_v44 = vrot.slane %v653_v36, %v1695_v3  ;;  %v739_v50 = vsel %vm706_vm0, %v710_v39, %v698_v42  ;;  %v651_v60 = vrot.slane %v1853_v28, 2  ;;  %v677_v61 = vrot.slane %v636_v56, %v1695_v3  ;;  %v778_v32 = vld [vmem:[#allocation5 + $0xf8] sm:$0xff] }
 0x41f   :  { %v699_v45 = vsel %vm665_vm3, %v673_v37, 0.0  ;;  %v701_v48 = vsel %vm665_vm3, %v681_v43, 0.0  ;;  %v657_v62 = vrot.slane %v1853_v28, 5  ;;  %v689_v20 = vrot.slane %v642_v58, %v1695_v3 }
 0x420   :  { %v740_v47 = vsel %vm706_vm0, %v714_v38, %v699_v45  ;;  %v742_v51 = vsel %vm706_vm0, %v722_v44, %v701_v48  ;;  %v718_v4 = vrot.slane %v651_v60, %v1695_v3  ;;  %v700_v1 = vsel %vm665_vm3, %v677_v61, 0.0 }
 0x421   :  { %850 = vmatprep.mubr.f32.mxu0 %v740_v47  ;;  %v730_v7 = vrot.slane %v657_v62, %v1695_v3  ;;  %v703_v9 = vsel %vm665_vm3, %v689_v20, 0.0  ;;  %v640_v18 = vrot.slane %v1855_v29, 4  ;;  %v646_v24 = vrot.slane %v1855_v29, 7 }
 0x422   :  { %851 = vmatmul.mubr.f32.vlgmr.msra.gmra.mrb[2].mxu0 %v739_v50  ;;  %v741_v11 = vsel %vm706_vm0, %v718_v4, %v700_v1  ;;  %v655_v15 = vrot.slane %v1853_v28, 4  ;;  %v661_v19 = vrot.slane %v1853_v28, 7  ;;  %v1369_v35 = vpack.c.bf16 %v761_v27, %v753_v26 }
 0x423   :  { %1354 = vmatpush1.bf16.xpose.msra.mxu0 %v1353_v46  ;;  %920 = vmatprep.mubr.f32.mxu0 %v742_v51  ;;  %v744_v12 = vsel %vm706_vm0, %v730_v7, %v703_v9  ;;  %v685_v17 = vrot.slane %v640_v18, %v1695_v3  ;;  %v697_v25 = vrot.slane %v646_v24, %v1695_v3  ;;  %v644_v42 = vrot.slane %v1855_v29, 6 }
 0x424   :  { %1356 = vmatprep.subr.bf16.mxu0 %v1355_v49  ;;  %v726_v30 = vrot.slane %v655_v15, %v1695_v3  ;;  %v738_v34 = vrot.slane %v661_v19, %v1695_v3  ;;  %v1371_v37 = vpack.c.bf16 %v778_v32, %v770_v31  ;;  %v1373_v43 = vpack.c.bf16 %v777_v41, %v769_v40  ;;  %v1190_v49 = vld [vmem:[%s1951_s6] ss:$0 sm:$0xff]  ;;  %s1608_s6 = smov [#allocation7]  }
 0x425   :  { %v702_v33 = vsel %vm665_vm3, %v685_v17, 0.0  ;;  %v705_v36 = vsel %vm665_vm3, %v697_v25, 0.0  ;;  %v659_v44 = vrot.slane %v1853_v28, 6  ;;  %v693_v45 = vrot.slane %v644_v42, %v1695_v3 }
 0x426   :  { %v743_v38 = vsel %vm706_vm0, %v726_v30, %v702_v33  ;;  %v746_v39 = vsel %vm706_vm0, %v738_v34, %v705_v36 }
 0x427   :  { %v734_v46 = vrot.slane %v659_v44, %v1695_v3  ;;  %v704_v47 = vsel %vm665_vm3, %v693_v45, 0.0  ;;  %v1191_v3 = vld [vmem:[%s1953_s8] ss:$0 sm:$0xff]  ;;  %s1176_s8 = sshll.u32 %s1608_s6, 4  ;;  %s1177_s8 = int_to_ptr.vmem [resolvable:$true] %s1176_s8 }
 0x428   :  { %s1558_s14 = scalar_lea.vmem %s1177_s8, 32  ;;  %p1563_p3 = scmp.lt.s32.totalorder %s1177_s8, %s1177_s8 }
 0x429   :  { %v745_v48 = vsel %vm706_vm0, %v734_v46, %v704_v47  ;;  %p1559_p2 = scmp.ne.s32.totalorder %s1177_s8, %s1558_s14  ;;  %p1564_p4 = scmp.lt.s32.totalorder %s1558_s14, %s1558_s14 }
 0x42b   :  { %1358 = vmatpush1.bf16.xpose.msra.mxu0 %v1357_v57  ;;  %p1565_p5 = por %p1564_p4, %p1563_p3 }
 0x42c   :  { %1360 = vmatprep.subr.bf16.mxu0 %v1359_v59 }
 0x42d   :  { %p1566_p6 = pnand %p1565_p5, %p1559_p2 }
 0x432   :  { %921 = vmatmul.mubr.f32.vlgmr.msra.gmra.mrb[2].mxu0 %v741_v11 }
 0x433   :  { %1362 = vmatpush1.bf16.xpose.msra.mxu0 %v1361_v8  ;;  %990 = vmatprep.mubr.f32.mxu0 %v744_v12 }
 0x434   :  { %1364 = vmatprep.subr.bf16.mxu0 %v1363_v10 }
 0x43b   :  { %1366 = vmatpush1.bf16.xpose.msra.mxu0 %v1365_v21 }
 0x43c   :  { %1368 = vmatprep.subr.bf16.mxu0 %v1367_v14 }
 0x442   :  { %991 = vmatmul.mubr.f32.vlgmr.msra.gmra.mrb[2].mxu0 %v743_v38 }
 0x443   :  { %1370 = vmatpush1.bf16.xpose.msra.mxu0 %v1369_v35  ;;  %1060 = vmatprep.mubr.f32.mxu0 %v746_v39 }
 0x444   :  { %1372 = vmatprep.subr.bf16.mxu0 %v1371_v37 }
 0x44b   :  { %1374 = vmatpush1.bf16.xpose.msra.mxu0 %v1373_v43 }
 0x452   :  { %1061 = vmatmul.mubr.f32.vlgmr.msra.gmra.mrb[2].mxu0 %v745_v48 }
 0x525   :  { %v1062_v29 = vpop.f32.mrb[2].mxu0 }
 0x526   :  { %v1379_v50 = vadd.f32 %v1190_v49, %v1062_v29  ;;  %v1064_v51 = vpop.f32.mrb[3].mxu0 }
 0x528   :  { %v1066_v28 = vmax.f32 %v1379_v50, 0.0 }
 0x52a   :  { %1271 = vmatmul.mubr.msk.f32.vlgmr.msra.gmra.mrb[6].mxu1 %vm1076_vm1, %v1066_v28 }
 0x5fd   :  { %v1152_v52 = vpop.f32.mrb[6].mxu1 }
 0x5fe   :  { %v1153_v53 = vadd.f32 %v1191_v3, %v1152_v52  ;;  %v1272_v2 = vpop.f32.mrb[7].mxu1 }
 0x600   :  { %v1157_v54 = vsel %vm1156_vm4, %v1153_v53, -inf }
 0x601   :  { %1158 = vmax.xlane.f32.xlu1 %v1157_v54 }
 0x68e   :  { %v1159_v55 = vpop.xlane.xlu1 %1158 }
 0x68f   :  { %v1160_v56 = vsub.f32 %v1153_v53, %v1159_v55 }
 0x691   :  { %v1161_v57 = vmul.f32 1.442695, %v1160_v56 }
 0x693   :  { %1510 = vpow2.f32 %v1161_v57 }
 0x69d   :  { %v1511_v58 = vpop.eup %1510 }
 0x69e   :  { %v1163_v59 = vsel %vm1156_vm4, %v1511_v58, 0.0 }
 0x69f   :  { %1164 = vadd.xlane.f32.xlu0 %v1163_v59 }
 0x72c   :  { %v1165_v60 = vpop.xlane.xlu0 %1164 }
 0x72d   :  { %1512 = vlog2.f32 %v1165_v60 }
 0x737   :  { %v1513_v61 = vpop.eup %1512 }
 0x738   :  { %v1167_v62 = vmul.f32 0.6931472, %v1513_v61 }
 0x73a   :  { %v1168_v20 = vsub.f32 %v1160_v56, %v1167_v62 }
 0x73c   :  { %1169 = vst.msk [vmem:[#allocation7] sm:$0x3] %vm1156_vm4, %v1168_v20 }
 0x73d   :  { %1569 = shalt.err (!%p1566_p6)
}
 0x73e   :  { %s1570_s17 = scalar_lea.hbm %s1954_s9, 32 }
 0x73f   :  { %p1571_p7 = scmp.ne.s32.totalorder %s1954_s9, %s1570_s17  ;;  %p1574_p8 = scmp.lt.u32.totalorder %s1570_s17, %s1954_s9 }
 0x741   :  { %p1576_p9 = pnand %p1574_p8, %p1571_p7 }
 0x743   :  { %1579 = shalt.err (!%p1576_p9)
}
 0x744   :  { %1179 = dma.vmem_to_hbm [thread:$0]  %s1177_s8, 32, %s1954_s9, [#allocation4]  }
 0x745   :  { %1584 = dma.done.wait [#allocation4], 32  }
 0x746   :  { %1585 = vsyncadd [#allocation4], 4294967264 }
 0x747   :  { %1183 = vsyncpa [#allocation3], 1 }
 0x748   :  { %1184 = vsyncpa [#allocation6], 1 }
 0x749   :  { %1185 = vsyncpa [#allocation4], 1 }

</bundles_post_ra>
